<compile_context>
chip_gen: v6e
topology: v6e:2x2x1
jax: 0.10.0
libtpu: 0.0.40
codegen_flags: <defaults>
</compile_context>

<pallas_src>
import numpy as np
import jax
import jax.numpy as jnp
from jax.experimental import pallas as pl
from jax.experimental.pallas import tpu as pltpu

_VMEM_BUDGET = 38 * 1024 * 1024   # per-step residency target (fits v7x 64 MiB)
_VMEM_LIMIT_CAP = 48 * 1024 * 1024


def _round_up(x, m):
    return (x + m - 1) // m * m


def _divisor_tile(total, cap):
    """Largest multiple of 128 <= cap that divides `total` (a 128-multiple)."""
    cap = max(128, min(cap, total))
    cap = cap // 128 * 128
    for cand in range(cap, 127, -128):
        if total % cand == 0:
            return cand
    return 128


def _vmem_estimate(tm, tl, d_k, d_pad, cd_b, act_b, out_b,
                   store_preact, use_acc_scratch):
    b = 2 * tm * d_k * cd_b            # x tile (double-buffered, held over j)
    b += 2 * d_k * tl * cd_b           # W_enc L-tile
    b += 2 * tl * d_pad * cd_b         # W_dec L-tile
    b += 2 * tl * 4 + 2 * d_pad * 4    # biases
    b += 2 * tm * tl * act_b           # latents output tile
    if store_preact:
        b += 2 * tm * tl * act_b       # preact output tile
    b += 2 * tm * d_pad * out_b        # reconstruction output tile
    if use_acc_scratch:
        b += tm * d_pad * 4            # f32 accumulator scratch
    return b


def _make_sae_kernel(store_preact, acc_in_out):
    """Grid = (batch tiles i [parallel], latent tiles j [arbitrary/reduction]).

    The decoder output is accumulated across j either directly in the resident
    out block (f32 outputs) or in an f32 VMEM scratch (narrow outputs).
    """
    def kernel(x_ref, w_enc_ref, b_enc_ref, w_dec_ref, b_dec_ref, *rest):
        if store_preact:
            latents_ref, out_ref, preact_ref = rest[0], rest[1], rest[2]
            scratch = rest[3:]
        else:
            latents_ref, out_ref = rest[0], rest[1]
            preact_ref = None
            scratch = rest[2:]
        acc_ref = out_ref if acc_in_out else scratch[0]

        j = pl.program_id(1)

        # Encoder matmul on the MXU (f32 accumulation) + bias; ReLU on the VPU.
        preact = jnp.dot(x_ref[...], w_enc_ref[...],
                         preferred_element_type=jnp.float32) + b_enc_ref[...]
        latents = jnp.maximum(preact, 0.0)

        # Decoder partial product for this latent tile.
        partial = jnp.dot(latents.astype(w_dec_ref.dtype), w_dec_ref[...],
                          preferred_element_type=jnp.float32)

        @pl.when(j == 0)
        def _():
            acc_ref[...] = (b_dec_ref[...] + partial).astype(acc_ref.dtype)

        @pl.when(j > 0)
        def _():
            acc_ref[...] = (acc_ref[...] + partial).astype(acc_ref.dtype)

        # Lane-dense per-tile activation stores (tl is a multiple of 128).
        latents_ref[...] = latents.astype(latents_ref.dtype)
        if store_preact:
            preact_ref[...] = preact.astype(preact_ref.dtype)

        if not acc_in_out:
            @pl.when(j == pl.num_programs(1) - 1)
            def _():
                out_ref[...] = acc_ref[...].astype(out_ref.dtype)

    return kernel


def _pad2d(a, shape, dtype):
    """Pad-with-zeros + cast; identity (no copy op) if already conforming."""
    if a.shape == tuple(shape):
        return a if a.dtype == jnp.dtype(dtype) else a.astype(dtype)
    return jnp.zeros(shape, dtype).at[:a.shape[0], :a.shape[1]].set(
        a.astype(dtype))


def _pad_bias(a, n_pad):
    a = a.astype(jnp.float32)
    if a.shape[0] != n_pad:
        a = jnp.zeros((n_pad,), jnp.float32).at[:a.shape[0]].set(a)
    return a.reshape(1, n_pad)


def sae_forward(x, w_enc, b_enc, w_dec, b_dec, *,
                tm=None, tl=None,
                compute_dtype=jnp.bfloat16,
                act_dtype=jnp.bfloat16,
                return_preact=True,
                out_dtype=None):
    """Pallas SAE forward (topk=None path).

    x: [N, D], w_enc: [D, L], b_enc: [L], w_dec: [L, D], b_dec: [D].
    compute_dtype: dtype fed to the MXU (accumulation is always f32).
    act_dtype:     storage dtype of the [N, L] latents / preact outputs
                   (bf16 default -> half the dominant HBM writeback).
    return_preact: skip materializing preact entirely when False.
    """
    N, D = x.shape
    L = w_enc.shape[1]
    if out_dtype is None:
        out_dtype = x.dtype

    d_pad = _round_up(D, 128)          # decoder-output lane axis only
    l128 = _round_up(L, 128)

    cd_b = np.dtype(compute_dtype).itemsize
    act_b = np.dtype(act_dtype).itemsize
    out_b = np.dtype(out_dtype).itemsize
    acc_in_out = np.dtype(out_dtype) == np.dtype(jnp.float32)

    # ---- tile selection under the VMEM residency budget -------------------
    if tm is None:
        tm_sel = min(512, _round_up(N, 128))
        if N > 128:   # give v7x's 2 TensorCores >= 2 batch tiles to shard
            tm_sel = min(tm_sel, _round_up((N + 1) // 2, 128))
    else:
        tm_sel = _round_up(tm, 8)
    tl_sel = _divisor_tile(l128, 1024) if tl is None else _round_up(tl, 128)

    def est(tm_, tl_):
        return _vmem_estimate(tm_, tl_, D, d_pad, cd_b, act_b, out_b,
                              return_preact, not acc_in_out)

    while est(tm_sel, tl_sel) > _VMEM_BUDGET:
        if tl is None and tl_sel > 128:
            tl_sel = _divisor_tile(l128, tl_sel - 128)
        elif tm is None and tm_sel > 128:
            tm_sel -= 128
        else:
            break
    tm, tl = tm_sel, tl_sel

    n_pad = _round_up(N, tm)
    l_pad = _round_up(l128, tl)

    cd = compute_dtype
    xp = _pad2d(x, (n_pad, D), cd)               # contraction axis unpadded
    wep = _pad2d(w_enc, (D, l_pad), cd)
    wdp = _pad2d(w_dec, (l_pad, d_pad), cd)
    bep = _pad_bias(b_enc, l_pad)
    bdp = _pad_bias(b_dec, d_pad)

    grid = (n_pad // tm, l_pad // tl)

    out_shapes = [
        jax.ShapeDtypeStruct((n_pad, l_pad), act_dtype),   # latents
        jax.ShapeDtypeStruct((n_pad, d_pad), out_dtype),   # reconstruction
    ]
    out_specs = [
        pl.BlockSpec((tm, tl), lambda i, j: (i, j)),
        pl.BlockSpec((tm, d_pad), lambda i, j: (i, 0)),    # resident over j
    ]
    if return_preact:
        out_shapes.append(jax.ShapeDtypeStruct((n_pad, l_pad), act_dtype))
        out_specs.append(pl.BlockSpec((tm, tl), lambda i, j: (i, j)))

    scratch_shapes = ([] if acc_in_out
                      else [pltpu.VMEM((tm, d_pad), jnp.float32)])

    vmem_limit = int(min(max(est(tm, tl) + 8 * 1024 * 1024, 32 * 1024 * 1024),
                         _VMEM_LIMIT_CAP))

    results = pl.pallas_call(
        _make_sae_kernel(return_preact, acc_in_out),
        out_shape=tuple(out_shapes),
        grid_spec=pltpu.PrefetchScalarGridSpec(
            num_scalar_prefetch=0,
            grid=grid,
            in_specs=[
                pl.BlockSpec((tm, D), lambda i, j: (i, 0)),      # x batch tile
                pl.BlockSpec((D, tl), lambda i, j: (0, j)),      # W_enc L-tile
                pl.BlockSpec((1, tl), lambda i, j: (0, j)),      # b_enc L-tile
                pl.BlockSpec((tl, d_pad), lambda i, j: (j, 0)),  # W_dec L-tile
                pl.BlockSpec((1, d_pad), lambda i, j: (0, 0)),   # b_dec
            ],
            out_specs=tuple(out_specs),
            scratch_shapes=scratch_shapes,
        ),
        compiler_params=pltpu.CompilerParams(
            dimension_semantics=("parallel", "arbitrary"),
            vmem_limit_bytes=vmem_limit),
    )(xp, wep, bep, wdp, bdp)

    latents = results[0][:N, :L]
    out = results[1][:N, :D]
    preact = results[2][:N, :L] if return_preact else None
    num_dead = jnp.array(0, dtype=jnp.int32)
    return latents, out, preact, num_dead


def _reference(x, w_enc, b_enc, w_dec, b_dec, compute_dtype):
    """Pure-JAX reference using the same MXU input dtype as the kernel."""
    cd = compute_dtype
    preact = jnp.dot(x.astype(cd), w_enc.astype(cd),
                     preferred_element_type=jnp.float32) + b_enc.astype(
                         jnp.float32)
    latents = jnp.maximum(preact, 0.0)
    out = jnp.dot(latents.astype(cd), w_dec.astype(cd),
                  preferred_element_type=jnp.float32) + b_dec.astype(
                      jnp.float32)
    return latents, out, preact   # f32


if __name__ == "__main__":
    # Small shapes consistent with the module: input_dims=32, expansion=8.
    N, D, expansion = 16, 32, 8
    L = D * expansion  # num_latents = 256

    key = jax.random.PRNGKey(0)
    kx, ke, kd = jax.random.split(key, 3)

    x = jax.random.normal(kx, (N, D), dtype=jnp.float32)

    # Deterministic kaiming-uniform-style init (gain=sqrt(2), fan_in = dim 1),
    # matching torch.nn.init.kaiming_uniform_ bounds on the same shapes.
    bound_enc = jnp.sqrt(6.0 / L)   # W_enc shape (D, L) -> fan_in = L
    bound_dec = jnp.sqrt(6.0 / D)   # W_dec shape (L, D) -> fan_in = D
    w_enc = jax.random.uniform(ke, (D, L), jnp.float32, -bound_enc, bound_enc)
    w_dec = jax.random.uniform(kd, (L, D), jnp.float32, -bound_dec, bound_dec)
    b_enc = jnp.zeros((L,), jnp.float32)
    b_dec = jnp.zeros((D,), jnp.float32)

    # ---- f32 compute + f32 activation path: tight parity check. ----
    lat32, out32, pre32, nd32 = jax.block_until_ready(
        sae_forward(x, w_enc, b_enc, w_dec, b_dec,
                    compute_dtype=jnp.float32, act_dtype=jnp.float32))
    lat_r, out_r, pre_r = _reference(x, w_enc, b_enc, w_dec, b_dec,
                                     jnp.float32)
    assert lat32.shape == (N, L) and out32.shape == (N, D)
    assert pre32.shape == (N, L)
    assert jnp.allclose(pre32, pre_r, atol=1e-4, rtol=1e-4)
    assert jnp.allclose(lat32, lat_r, atol=1e-4, rtol=1e-4)
    assert jnp.allclose(out32, out_r, atol=1e-4, rtol=1e-4)

    # ---- default perf path (bf16 MXU, bf16 activation stores). ----
    latb, outb, preb, ndb = jax.block_until_ready(
        sae_forward(x, w_enc, b_enc, w_dec, b_dec))
    lat_rb, out_rb, pre_rb = _reference(x, w_enc, b_enc, w_dec, b_dec,
                                        jnp.bfloat16)
    assert latb.dtype == jnp.bfloat16 and preb.dtype == jnp.bfloat16
    assert outb.dtype == x.dtype
    assert jnp.allclose(preb.astype(jnp.float32), pre_rb, atol=2e-2, rtol=2e-2)
    assert jnp.allclose(latb.astype(jnp.float32), lat_rb, atol=2e-2, rtol=2e-2)
    assert jnp.allclose(outb, out_rb, atol=2e-2, rtol=2e-2)

    # ---- return_preact=False path (skips the [N, L] preact writeback). ----
    latn, outn, pren, _ = jax.block_until_ready(
        sae_forward(x, w_enc, b_enc, w_dec, b_dec, return_preact=False))
    assert pren is None
    assert jnp.allclose(latn.astype(jnp.float32),
                        latb.astype(jnp.float32), atol=1e-6)
    assert jnp.allclose(outn, outb, atol=1e-6)

    # ---- bf16 input/output path (exercises the f32 scratch accumulator). ----
    latc, outc, prec, _ = jax.block_until_ready(
        sae_forward(x.astype(jnp.bfloat16), w_enc, b_enc, w_dec, b_dec))
    lat_rc, out_rc, _ = _reference(x.astype(jnp.bfloat16), w_enc, b_enc,
                                   w_dec, b_dec, jnp.bfloat16)
    assert outc.dtype == jnp.bfloat16
    assert jnp.allclose(outc.astype(jnp.float32), out_rc, atol=3e-2, rtol=3e-2)
    assert jnp.allclose(latc.astype(jnp.float32), lat_rc, atol=3e-2, rtol=3e-2)

    assert int(nd32) == 0 and int(ndb) == 0
    print("KERNEL_OK")
</pallas_src>

<mosaic_0001>
module attributes {stable_mosaic.version = 11 : i64} {
  func.func @kernel(%arg0: i32, %arg1: i32, %arg2: memref<128x32xf32, #tpu.memory_space<vmem>>, %arg3: memref<32x256xf32, #tpu.memory_space<vmem>>, %arg4: memref<1x256xf32, #tpu.memory_space<vmem>>, %arg5: memref<256x128xf32, #tpu.memory_space<vmem>>, %arg6: memref<1x128xf32, #tpu.memory_space<vmem>>, %arg7: memref<128x256xf32, #tpu.memory_space<vmem>>, %arg8: memref<128x128xf32, #tpu.memory_space<vmem>>, %arg9: memref<128x256xf32, #tpu.memory_space<vmem>>) attributes {dimension_semantics = [#tpu.dimension_semantics<parallel>, #tpu.dimension_semantics<arbitrary>], iteration_bounds = array<i64: 1, 1>, scalar_prefetch = 0 : i64, scratch_operands = 0 : i64, tpu.core_type = #tpu.core_type<tc>, window_params = [{transform_indices = @transform_0, window_bounds = array<i64: 128, 32>}, {transform_indices = @transform_1, window_bounds = array<i64: 32, 256>}, {transform_indices = @transform_2, window_bounds = array<i64: 1, 256>}, {transform_indices = @transform_3, window_bounds = array<i64: 256, 128>}, {pipeline_mode = #tpu.pipeline_mode<synchronous>, transform_indices = @transform_4, window_bounds = array<i64: 1, 128>}, {transform_indices = @transform_5, window_bounds = array<i64: 128, 256>}, {transform_indices = @transform_6, window_bounds = array<i64: 128, 128>}, {transform_indices = @transform_7, window_bounds = array<i64: 128, 256>}]} {
    %c0 = arith.constant 0 : index
    %c0_0 = arith.constant 0 : index
    %0 = vector.load %arg2[%c0, %c0_0] : memref<128x32xf32, #tpu.memory_space<vmem>>, vector<128x32xf32>
    %c0_1 = arith.constant 0 : index
    %c0_2 = arith.constant 0 : index
    %1 = vector.load %arg3[%c0_1, %c0_2] : memref<32x256xf32, #tpu.memory_space<vmem>>, vector<32x256xf32>
    %cst = arith.constant dense<0.000000e+00> : vector<128x256xf32>
    %2 = tpu.matmul %0, %1, %cst {dimension_numbers = #tpu.dot_dimension_numbers<[1], [0], [0], [1], [0, 0, 1, 1], [], []>} : vector<128x32xf32>, vector<32x256xf32>, vector<128x256xf32> -> vector<128x256xf32>
    %c0_3 = arith.constant 0 : index
    %c0_4 = arith.constant 0 : index
    %3 = vector.load %arg4[%c0_3, %c0_4] : memref<1x256xf32, #tpu.memory_space<vmem>>, vector<1x256xf32>
    %4 = vector.broadcast %3 : vector<1x256xf32> to vector<128x256xf32>
    %5 = arith.addf %2, %4 : vector<128x256xf32>
    %cst_5 = arith.constant 0.000000e+00 : f32
    %6 = vector.broadcast %cst_5 : f32 to vector<128x256xf32>
    %7 = arith.maximumf %5, %6 : vector<128x256xf32>
    %c0_6 = arith.constant 0 : index
    %c0_7 = arith.constant 0 : index
    %8 = vector.load %arg5[%c0_6, %c0_7] : memref<256x128xf32, #tpu.memory_space<vmem>>, vector<256x128xf32>
    %cst_8 = arith.constant dense<0.000000e+00> : vector<128x128xf32>
    %9 = tpu.matmul %7, %8, %cst_8 {dimension_numbers = #tpu.dot_dimension_numbers<[1], [0], [0], [1], [0, 0, 1, 1], [], []>} : vector<128x256xf32>, vector<256x128xf32>, vector<128x128xf32> -> vector<128x128xf32>
    %c0_i32 = arith.constant 0 : i32
    %10 = arith.cmpi eq, %arg1, %c0_i32 : i32
    %11 = arith.extui %10 : i1 to i32
    %c0_i32_9 = arith.constant 0 : i32
    %12 = arith.cmpi ne, %11, %c0_i32_9 : i32
    scf.if %12 {
      %c0_16 = arith.constant 0 : index
      %c0_17 = arith.constant 0 : index
      %18 = vector.load %arg6[%c0_16, %c0_17] : memref<1x128xf32, #tpu.memory_space<vmem>>, vector<1x128xf32>
      %19 = vector.broadcast %18 : vector<1x128xf32> to vector<128x128xf32>
      %20 = arith.addf %19, %9 : vector<128x128xf32>
      %c0_18 = arith.constant 0 : index
      %c0_19 = arith.constant 0 : index
      %21 = vector.load %arg8[%c0_18, %c0_19] : memref<128x128xf32, #tpu.memory_space<vmem>>, vector<128x128xf32>
      tpu.vector_store %arg8[%c0_18, %c0_19], %20 {strides = array<i32>} : memref<128x128xf32, #tpu.memory_space<vmem>>, vector<128x128xf32>,
    } else {
    }
    %c0_i32_10 = arith.constant 0 : i32
    %13 = arith.cmpi sgt, %arg1, %c0_i32_10 : i32
    %14 = arith.extui %13 : i1 to i32
    %c0_i32_11 = arith.constant 0 : i32
    %15 = arith.cmpi ne, %14, %c0_i32_11 : i32
    scf.if %15 {
      %c0_16 = arith.constant 0 : index
      %c0_17 = arith.constant 0 : index
      %18 = vector.load %arg8[%c0_16, %c0_17] : memref<128x128xf32, #tpu.memory_space<vmem>>, vector<128x128xf32>
      %19 = arith.addf %18, %9 : vector<128x128xf32>
      %c0_18 = arith.constant 0 : index
      %c0_19 = arith.constant 0 : index
      %20 = vector.load %arg8[%c0_18, %c0_19] : memref<128x128xf32, #tpu.memory_space<vmem>>, vector<128x128xf32>
      tpu.vector_store %arg8[%c0_18, %c0_19], %19 {strides = array<i32>} : memref<128x128xf32, #tpu.memory_space<vmem>>, vector<128x128xf32>,
    } else {
    }
    %c0_12 = arith.constant 0 : index
    %c0_13 = arith.constant 0 : index
    %16 = vector.load %arg7[%c0_12, %c0_13] : memref<128x256xf32, #tpu.memory_space<vmem>>, vector<128x256xf32>
    tpu.vector_store %arg7[%c0_12, %c0_13], %7 {strides = array<i32>} : memref<128x256xf32, #tpu.memory_space<vmem>>, vector<128x256xf32>,
    %c0_14 = arith.constant 0 : index
    %c0_15 = arith.constant 0 : index
    %17 = vector.load %arg9[%c0_14, %c0_15] : memref<128x256xf32, #tpu.memory_space<vmem>>, vector<128x256xf32>
    tpu.vector_store %arg9[%c0_14, %c0_15], %5 {strides = array<i32>} : memref<128x256xf32, #tpu.memory_space<vmem>>, vector<128x256xf32>,
    return
  }
  func.func @transform_0(%arg0: i32, %arg1: i32) -> (i32, i32) {
    %c0_i32 = arith.constant 0 : i32
    %c0_i32_0 = arith.constant 0 : i32
    return %arg0, %c0_i32 : i32, i32
  }
  func.func @transform_1(%arg0: i32, %arg1: i32) -> (i32, i32) {
    %c0_i32 = arith.constant 0 : i32
    %c0_i32_0 = arith.constant 0 : i32
    return %c0_i32, %arg1 : i32, i32
  }
  func.func @transform_2(%arg0: i32, %arg1: i32) -> (i32, i32) {
    %c0_i32 = arith.constant 0 : i32
    %c0_i32_0 = arith.constant 0 : i32
    return %c0_i32, %arg1 : i32, i32
  }
  func.func @transform_3(%arg0: i32, %arg1: i32) -> (i32, i32) {
    %c0_i32 = arith.constant 0 : i32
    %c0_i32_0 = arith.constant 0 : i32
    return %arg1, %c0_i32 : i32, i32
  }
  func.func @transform_4(%arg0: i32, %arg1: i32) -> (i32, i32) {
    %c0_i32 = arith.constant 0 : i32
    %c0_i32_0 = arith.constant 0 : i32
    %c0_i32_1 = arith.constant 0 : i32
    return %c0_i32, %c0_i32_0 : i32, i32
  }
  func.func @transform_5(%arg0: i32, %arg1: i32) -> (i32, i32) {
    %c0_i32 = arith.constant 0 : i32
    return %arg0, %arg1 : i32, i32
  }
  func.func @transform_6(%arg0: i32, %arg1: i32) -> (i32, i32) {
    %c0_i32 = arith.constant 0 : i32
    %c0_i32_0 = arith.constant 0 : i32
    return %arg0, %c0_i32 : i32, i32
  }
  func.func @transform_7(%arg0: i32, %arg1: i32) -> (i32, i32) {
    %c0_i32 = arith.constant 0 : i32
    return %arg0, %arg1 : i32, i32
  }
}

</mosaic_0001>

<bundles_post_ra>
// kernel: tpu_custom_call.1
= control target key start
LH: loop header
LB: loop body
LE: loop exit
PB: predicated region body
PF: predicated region fallthrough
CT: control target
= control target key end

     0   :  { %13 = vsyncpa [#allocation3], 0  ;;  %s1162_s0 = inlined_call_operand.vmem [shape: f32[128,32], index: 0, kind: input, shape index: {}]   ;;  %s1163_s1 = inlined_call_operand.vmem [shape: f32[32,256], index: 1, kind: input, shape index: {}]   ;;  %s1164_s2 = inlined_call_operand.vmem [shape: f32[1,256], index: 2, kind: input, shape index: {}]   ;;  %s1165_s3 = inlined_call_operand.hbm [shape: f32[256,128], index: 3, kind: input, shape index: {}]   ;;  %s1166_s4 = inlined_call_operand.vmem [shape: f32[1,128], index: 4, kind: input, shape index: {}]   ;;  %s1167_s5 = inlined_call_operand.hbm [shape: f32[128,256], index: 5, kind: output, shape index: {0}]   ;;  %s1168_s6 = inlined_call_operand.hbm [shape: f32[128,128], index: 6, kind: output, shape index: {1}]   ;;  %s1169_s7 = inlined_call_operand.hbm [shape: f32[128,256], index: 7, kind: output, shape index: {2}]  }
   0x1   :  { %14 = vsyncpa [#allocation4], 0 }
   0x2   :  { %15 = vsyncpa [#allocation7], 0  ;;  %s925_s24 = smov [#allocation2]  }
   0x3   :  { %s27_s25 = sshll.u32 %s925_s24, 4  ;;  %s28_s25 = int_to_ptr.vmem [resolvable:$true] %s27_s25 }
   0x4   :  { %s847_s26 = scalar_lea.vmem %s28_s25, 4096  ;;  %p852_p1 = scmp.lt.s32.totalorder %s28_s25, %s28_s25 }
   0x5   :  { %p848_p0 = scmp.ne.s32.totalorder %s28_s25, %s847_s26  ;;  %p853_p2 = scmp.lt.s32.totalorder %s847_s26, %s847_s26 }
   0x7   :  { %p854_p3 = por %p853_p2, %p852_p1 }
   0x9   :  { %p855_p4 = pnand %p854_p3, %p848_p0 }
   0xb   :  { %858 = shalt.err (!%p855_p4)
}
   0xc   :  { %s926_s27 = smov 128   ;;  %s927_s28 = smov 8  }
   0xd   :  { %33 = dma.hbm_to_vmem [thread:$0]  %s1165_s3, 4096, %s28_s25, [#allocation3], %s926_s27, %s926_s27, %s927_s28  }
   0xe   :  { %919 = dma.done.wait [#allocation3], 4096  }
   0xf   :  { %920 = vsyncadd [#allocation3], 4294963200  ;;  %v928_v0 = vmov 0.0   ;;  %v62_v1 = vld [vmem:[%s1163_s1 + $0x38] sm:$0xff]  ;;  %v61_v2 = vld [vmem:[%s1163_s1 + $0x30] sm:$0xff]  ;;  %vm75_vm0 = vcmask 261120   ;;  %v65_v57 = vlaneseq }
  0x10   :  { %188 = vmatprep.mubr.f32.mxu0 %v928_v0  ;;  %v60_v3 = vld [vmem:[%s1163_s1 + $0x28] sm:$0xff]  ;;  %148 = vmatprep.subr.mxu0 %v62_v1  ;;  %v59_v4 = vld [vmem:[%s1163_s1 + $0x20] sm:$0xff]  ;;  %v58_v5 = vld [vmem:[%s1163_s1 + $0x18] sm:$0xff] }
  0x11   :  { %149 = vmatpush1.msra.mxu0 %v61_v2  ;;  %v57_v6 = vld [vmem:[%s1163_s1 + $0x10] sm:$0xff]  ;;  %v56_v7 = vld [vmem:[%s1163_s1 + $0x8] sm:$0xff]  ;;  %v55_v8 = vld [vmem:[%s1163_s1] sm:$0xff]  ;;  %v66_v58 = vshrl.u32 %v65_v57, 7 }
  0x12   :  { %150 = vmatprep.subr.mxu0 %v60_v3  ;;  %v39_v9 = vld [vmem:[%s1162_s0] sm:$0xff]  ;;  %v348_v10 = vld [vmem:[#allocation2 + $0xf8] sm:$0xff]  ;;  %v347_v12 = vld [vmem:[#allocation2 + $0xf0] sm:$0xff] }
  0x13   :  { %151 = vmatpush1.msra.mxu0 %v59_v4  ;;  %v332_v11 = vld [vmem:[#allocation2 + $0x78] sm:$0xff]  ;;  %v331_v13 = vld [vmem:[#allocation2 + $0x70] sm:$0xff]  ;;  %v40_v14 = vld [vmem:[%s1162_s0 + $0x8] sm:$0xff]  ;;  %798 = vmatprep.subr.mxu1 %v348_v10  ;;  %v67_v59 = vsub.s32 0, %v66_v58  ;;  %v71_v61 = vsub.s32 1, %v66_v58 }
  0x14   :  { %152 = vmatprep.subr.mxu0 %v58_v5  ;;  %v346_v15 = vld [vmem:[#allocation2 + $0xe8] sm:$0xff]  ;;  %v345_v17 = vld [vmem:[#allocation2 + $0xe0] sm:$0xff]  ;;  %814 = vmatpush3.msra.mxu1 %v332_v11  ;;  %v41_v19 = vld [vmem:[%s1162_s0 + $0x10] sm:$0xff] }
  0x15   :  { %153 = vmatpush1.msra.mxu0 %v57_v6  ;;  %v330_v16 = vld [vmem:[#allocation2 + $0x68] sm:$0xff]  ;;  %v329_v18 = vld [vmem:[#allocation2 + $0x60] sm:$0xff]  ;;  %v344_v20 = vld [vmem:[#allocation2 + $0xd8] sm:$0xff]  ;;  %799 = vmatprep.subr.mxu1 %v347_v12 }
  0x16   :  { %154 = vmatprep.subr.mxu0 %v56_v7  ;;  %v328_v21 = vld [vmem:[#allocation2 + $0x58] sm:$0xff]  ;;  %v343_v22 = vld [vmem:[#allocation2 + $0xd0] sm:$0xff]  ;;  %815 = vmatpush3.msra.mxu1 %v331_v13  ;;  %v342_v25 = vld [vmem:[#allocation2 + $0xc8] sm:$0xff] }
  0x17   :  { %155 = vmatpush1.msra.mxu0 %v55_v8  ;;  %v327_v23 = vld [vmem:[#allocation2 + $0x50] sm:$0xff]  ;;  %v42_v24 = vld [vmem:[%s1162_s0 + $0x18] sm:$0xff]  ;;  %v326_v26 = vld [vmem:[#allocation2 + $0x48] sm:$0xff]  ;;  %800 = vmatprep.subr.mxu1 %v346_v15 }
  0x18   :  { %701 = vmatmul.mubr.msk.f32.vlgmr.msra.gmra.mxu0 %vm75_vm0, %v39_v9  ;;  %718 = vmatprep.subr.mxu0 %v348_v10  ;;  %v341_v27 = vld [vmem:[#allocation2 + $0xc0] sm:$0xff]  ;;  %v340_v30 = vld [vmem:[#allocation2 + $0xb8] sm:$0xff]  ;;  %v339_v32 = vld [vmem:[#allocation2 + $0xb0] sm:$0xff] }
  0x19   :  { %194 = vmatprep.mubr.f32.mxu0 %v928_v0  ;;  %719 = vmatpush3.msra.mxu0 %v332_v11  ;;  %v325_v28 = vld [vmem:[#allocation2 + $0x40] sm:$0xff]  ;;  %v324_v31 = vld [vmem:[#allocation2 + $0x38] sm:$0xff]  ;;  %v323_v33 = vld [vmem:[#allocation2 + $0x30] sm:$0xff] }
  0x1a   :  { %720 = vmatprep.subr.mxu0 %v347_v12  ;;  %816 = vmatpush3.msra.mxu1 %v330_v16  ;;  %v43_v29 = vld [vmem:[%s1162_s0 + $0x20] sm:$0xff]  ;;  %v44_v34 = vld [vmem:[%s1162_s0 + $0x28] sm:$0xff]  ;;  %v45_v39 = vld [vmem:[%s1162_s0 + $0x30] sm:$0xff] }
  0x1b   :  { %721 = vmatpush3.msra.mxu0 %v331_v13  ;;  %801 = vmatprep.subr.mxu1 %v345_v17  ;;  %v338_v35 = vld [vmem:[#allocation2 + $0xa8] sm:$0xff]  ;;  %v337_v37 = vld [vmem:[#allocation2 + $0xa0] sm:$0xff]  ;;  %v46_v40 = vld [vmem:[%s1162_s0 + $0x38] sm:$0xff] }
  0x1c   :  { %702 = vmatmul.mubr.msk.f32.gmra.mxu0 %vm75_vm0, %v40_v14  ;;  %722 = vmatprep.subr.mxu0 %v346_v15  ;;  %v322_v36 = vld [vmem:[#allocation2 + $0x28] sm:$0xff]  ;;  %v321_v38 = vld [vmem:[#allocation2 + $0x20] sm:$0xff]  ;;  %v49_v43 = vld [vmem:[%s1162_s0 + $0x50] sm:$0xff] }
  0x1d   :  { %200 = vmatprep.mubr.f32.mxu0 %v928_v0  ;;  %723 = vmatpush3.msra.mxu0 %v330_v16  ;;  %v47_v41 = vld [vmem:[%s1162_s0 + $0x40] sm:$0xff]  ;;  %v48_v42 = vld [vmem:[%s1162_s0 + $0x48] sm:$0xff]  ;;  %v50_v44 = vld [vmem:[%s1162_s0 + $0x58] sm:$0xff] }
  0x1e   :  { %724 = vmatprep.subr.mxu0 %v345_v17  ;;  %817 = vmatpush3.msra.mxu1 %v329_v18  ;;  %v51_v45 = vld [vmem:[%s1162_s0 + $0x60] sm:$0xff]  ;;  %v52_v46 = vld [vmem:[%s1162_s0 + $0x68] sm:$0xff]  ;;  %v53_v47 = vld [vmem:[%s1162_s0 + $0x70] sm:$0xff] }
  0x1f   :  { %725 = vmatpush3.msra.mxu0 %v329_v18  ;;  %802 = vmatprep.subr.mxu1 %v344_v20  ;;  %v54_v48 = vld [vmem:[%s1162_s0 + $0x78] sm:$0xff]  ;;  %v335_v51 = vld [vmem:[#allocation2 + $0x90] sm:$0xff]  ;;  %v334_v53 = vld [vmem:[#allocation2 + $0x88] sm:$0xff] }
  0x20   :  { %703 = vmatmul.mubr.msk.f32.gmra.mxu0 %vm75_vm0, %v41_v19  ;;  %726 = vmatprep.subr.mxu0 %v344_v20  ;;  %v336_v49 = vld [vmem:[#allocation2 + $0x98] sm:$0xff]  ;;  %v319_v52 = vld [vmem:[#allocation2 + $0x10] sm:$0xff]  ;;  %v318_v54 = vld [vmem:[#allocation2 + $0x8] sm:$0xff] }
  0x21   :  { %206 = vmatprep.mubr.f32.mxu0 %v928_v0  ;;  %727 = vmatpush3.msra.mxu0 %v328_v21  ;;  %v320_v50 = vld [vmem:[#allocation2 + $0x18] sm:$0xff]  ;;  %v333_v55 = vld [vmem:[#allocation2 + $0x80] sm:$0xff] }
  0x22   :  { %728 = vmatprep.subr.mxu0 %v343_v22  ;;  %818 = vmatpush3.msra.mxu1 %v328_v21  ;;  %v317_v56 = vld [vmem:[#allocation2] sm:$0xff] }
  0x23   :  { %729 = vmatpush3.msra.mxu0 %v327_v23  ;;  %803 = vmatprep.subr.mxu1 %v343_v22  ;;  %v63_v60 = vld [vmem:[%s1164_s2] sm:$0x3]  ;;  %s929_s2 = smov [#allocation5]  }
  0x24   :  { %704 = vmatmul.mubr.msk.f32.gmra.mxu0 %vm75_vm0, %v42_v24  ;;  %730 = vmatprep.subr.mxu0 %v342_v25  ;;  %v1087_v62 = vrot.slane %v63_v60, %v67_v59  ;;  %v1089_v63 = vrot.slane %v63_v60, %v71_v61  ;;  %s658_s11 = sshll.u32 %s929_s2, 4  ;;  %s659_s11 = int_to_ptr.vmem [resolvable:$true] %s658_s11 }
  0x25   :  { %212 = vmatprep.mubr.f32.mxu0 %v928_v0  ;;  %731 = vmatpush3.msra.mxu0 %v326_v26  ;;  %s859_s12 = scalar_lea.vmem %s659_s11, 4096  ;;  %p864_p6 = scmp.lt.s32.totalorder %s659_s11, %s659_s11 }
  0x26   :  { %732 = vmatprep.subr.mxu0 %v341_v27  ;;  %819 = vmatpush3.msra.mxu1 %v327_v23  ;;  %p860_p5 = scmp.ne.s32.totalorder %s659_s11, %s859_s12  ;;  %p865_p7 = scmp.lt.s32.totalorder %s859_s12, %s859_s12 }
  0x27   :  { %733 = vmatpush3.msra.mxu0 %v325_v28  ;;  %804 = vmatprep.subr.mxu1 %v342_v25 }
  0x28   :  { %705 = vmatmul.mubr.msk.f32.gmra.mxu0 %vm75_vm0, %v43_v29  ;;  %734 = vmatprep.subr.mxu0 %v340_v30  ;;  %p866_p8 = por %p865_p7, %p864_p6 }
  0x29   :  { %218 = vmatprep.mubr.f32.mxu0 %v928_v0  ;;  %735 = vmatpush3.msra.mxu0 %v324_v31 }
  0x2a   :  { %736 = vmatprep.subr.mxu0 %v339_v32  ;;  %820 = vmatpush3.msra.mxu1 %v326_v26  ;;  %p867_p9 = pnand %p866_p8, %p860_p5 }
  0x2b   :  { %737 = vmatpush3.msra.mxu0 %v323_v33  ;;  %805 = vmatprep.subr.mxu1 %v341_v27 }
  0x2c   :  { %706 = vmatmul.mubr.msk.f32.gmra.mxu0 %vm75_vm0, %v44_v34  ;;  %738 = vmatprep.subr.mxu0 %v338_v35 }
  0x2d   :  { %224 = vmatprep.mubr.f32.mxu0 %v928_v0  ;;  %739 = vmatpush3.msra.mxu0 %v322_v36 }
  0x2e   :  { %740 = vmatprep.subr.mxu0 %v337_v37  ;;  %821 = vmatpush3.msra.mxu1 %v325_v28 }
  0x2f   :  { %741 = vmatpush3.msra.mxu0 %v321_v38  ;;  %806 = vmatprep.subr.mxu1 %v340_v30 }
  0x30   :  { %707 = vmatmul.mubr.msk.f32.gmra.mxu0 %vm75_vm0, %v45_v39  ;;  %822 = vmatpush3.msra.mxu1 %v324_v31 }
  0x31   :  { %230 = vmatprep.mubr.f32.mxu0 %v928_v0  ;;  %807 = vmatprep.subr.mxu1 %v339_v32 }
  0x32   :  { %823 = vmatpush3.msra.mxu1 %v323_v33  ;;  %742 = vmatprep.subr.mxu0 %v336_v49 }
  0x33   :  { %808 = vmatprep.subr.mxu1 %v338_v35  ;;  %743 = vmatpush3.msra.mxu0 %v320_v50 }
  0x34   :  { %708 = vmatmul.mubr.msk.f32.gmra.mxu0 %vm75_vm0, %v46_v40  ;;  %824 = vmatpush3.msra.mxu1 %v322_v36 }
  0x35   :  { %236 = vmatprep.mubr.f32.mxu0 %v928_v0  ;;  %809 = vmatprep.subr.mxu1 %v337_v37 }
  0x36   :  { %825 = vmatpush3.msra.mxu1 %v321_v38  ;;  %744 = vmatprep.subr.mxu0 %v335_v51 }
  0x37   :  { %810 = vmatprep.subr.mxu1 %v336_v49  ;;  %745 = vmatpush3.msra.mxu0 %v319_v52 }
  0x38   :  { %709 = vmatmul.mubr.msk.f32.gmra.mxu0 %vm75_vm0, %v47_v41  ;;  %826 = vmatpush3.msra.mxu1 %v320_v50 }
  0x39   :  { %242 = vmatprep.mubr.f32.mxu0 %v928_v0  ;;  %811 = vmatprep.subr.mxu1 %v335_v51 }
  0x3a   :  { %827 = vmatpush3.msra.mxu1 %v319_v52  ;;  %746 = vmatprep.subr.mxu0 %v334_v53 }
  0x3b   :  { %812 = vmatprep.subr.mxu1 %v334_v53  ;;  %747 = vmatpush3.msra.mxu0 %v318_v54 }
  0x3c   :  { %710 = vmatmul.mubr.msk.f32.gmra.mxu0 %vm75_vm0, %v48_v42  ;;  %828 = vmatpush3.msra.mxu1 %v318_v54 }
  0x3d   :  { %248 = vmatprep.mubr.f32.mxu0 %v928_v0  ;;  %748 = vmatprep.subr.mxu0 %v333_v55 }
  0x3e   :  { %813 = vmatprep.subr.mxu1 %v333_v55  ;;  %749 = vmatpush3.msra.mxu0 %v317_v56 }
  0x3f   :  { %829 = vmatpush3.msra.mxu1 %v317_v56 }
  0x40   :  { %711 = vmatmul.mubr.msk.f32.gmra.mxu0 %vm75_vm0, %v49_v43 }
  0x41   :  { %254 = vmatprep.mubr.f32.mxu0 %v928_v0 }
  0x44   :  { %712 = vmatmul.mubr.msk.f32.gmra.mxu0 %vm75_vm0, %v50_v44 }
  0x45   :  { %260 = vmatprep.mubr.f32.mxu0 %v928_v0 }
  0x48   :  { %713 = vmatmul.mubr.msk.f32.gmra.mxu0 %vm75_vm0, %v51_v45 }
  0x49   :  { %266 = vmatprep.mubr.f32.mxu0 %v928_v0 }
  0x4c   :  { %714 = vmatmul.mubr.msk.f32.gmra.mxu0 %vm75_vm0, %v52_v46 }
  0x4d   :  { %272 = vmatprep.mubr.f32.mxu0 %v928_v0 }
  0x50   :  { %715 = vmatmul.mubr.msk.f32.gmra.mxu0 %vm75_vm0, %v53_v47 }
  0x51   :  { %278 = vmatprep.mubr.f32.mxu0 %v928_v0 }
  0x54   :  { %716 = vmatmul.mubr.msk.f32.gmra.mxu0 %vm75_vm0, %v54_v48 }
  0xd8   :  { %v190_v0 = vpop.f32.mrf.mxu0 }
  0xd9   :  { %v191_v1 = vadd.f32 %v190_v0, %v1087_v62 }
  0xda   :  { %v192_v2 = vpop.f32.mrf.mxu0 }
  0xdb   :  { %v285_v3 = vmax.f32 %v191_v1, 0.0  ;;  %621 = vst [vmem:[#allocation8] sm:$0xff] %v191_v1  ;;  %v193_v4 = vadd.f32 %v192_v2, %v1089_v63 }
  0xdc   :  { %v196_v5 = vpop.f32.mrf.mxu0 }
  0xdd   :  { %589 = vst [vmem:[#allocation5] sm:$0xff] %v285_v3  ;;  %v286_v6 = vmax.f32 %v193_v4, 0.0  ;;  %622 = vst [vmem:[#allocation8 + $0x8] sm:$0xff] %v193_v4  ;;  %v197_v7 = vadd.f32 %v196_v5, %v1087_v62 }
  0xde   :  { %v198_v8 = vpop.f32.mrf.mxu0 }
  0xdf   :  { %590 = vst [vmem:[#allocation5 + $0x8] sm:$0xff] %v286_v6  ;;  %v287_v9 = vmax.f32 %v197_v7, 0.0  ;;  %623 = vst [vmem:[#allocation8 + $0x10] sm:$0xff] %v197_v7  ;;  %v199_v10 = vadd.f32 %v198_v8, %v1089_v63  ;;  %413 = vmatprep.mubr.f32.mxu0 %v286_v6 }
  0xe0   :  { %v202_v11 = vpop.f32.mrf.mxu0  ;;  %414 = vmatmul.mubr.f32.vlgmr.msra.gmra.mxu0 %v285_v3 }
  0xe1   :  { %591 = vst [vmem:[#allocation5 + $0x10] sm:$0xff] %v287_v9  ;;  %v288_v12 = vmax.f32 %v199_v10, 0.0  ;;  %624 = vst [vmem:[#allocation8 + $0x18] sm:$0xff] %v199_v10  ;;  %v203_v13 = vadd.f32 %v202_v11, %v1087_v62 }
  0xe2   :  { %v204_v14 = vpop.f32.mrf.mxu0 }
  0xe3   :  { %592 = vst [vmem:[#allocation5 + $0x18] sm:$0xff] %v288_v12  ;;  %v289_v15 = vmax.f32 %v203_v13, 0.0  ;;  %625 = vst [vmem:[#allocation8 + $0x20] sm:$0xff] %v203_v13  ;;  %v205_v16 = vadd.f32 %v204_v14, %v1089_v63  ;;  %418 = vmatprep.mubr.f32.mxu0 %v288_v12 }
  0xe4   :  { %v208_v17 = vpop.f32.mrf.mxu0  ;;  %419 = vmatmul.mubr.f32.gmra.mxu0 %v287_v9 }
  0xe5   :  { %593 = vst [vmem:[#allocation5 + $0x20] sm:$0xff] %v289_v15  ;;  %v290_v18 = vmax.f32 %v205_v16, 0.0  ;;  %626 = vst [vmem:[#allocation8 + $0x28] sm:$0xff] %v205_v16  ;;  %v209_v19 = vadd.f32 %v208_v17, %v1087_v62 }
  0xe6   :  { %v210_v20 = vpop.f32.mrf.mxu0 }
  0xe7   :  { %594 = vst [vmem:[#allocation5 + $0x28] sm:$0xff] %v290_v18  ;;  %v291_v21 = vmax.f32 %v209_v19, 0.0  ;;  %627 = vst [vmem:[#allocation8 + $0x30] sm:$0xff] %v209_v19  ;;  %v211_v22 = vadd.f32 %v210_v20, %v1089_v63  ;;  %423 = vmatprep.mubr.f32.mxu0 %v290_v18 }
  0xe8   :  { %v214_v23 = vpop.f32.mrf.mxu0  ;;  %424 = vmatmul.mubr.f32.gmra.mxu0 %v289_v15 }
  0xe9   :  { %595 = vst [vmem:[#allocation5 + $0x30] sm:$0xff] %v291_v21  ;;  %628 = vst [vmem:[#allocation8 + $0x38] sm:$0xff] %v211_v22  ;;  %v215_v24 = vadd.f32 %v214_v23, %v1087_v62  ;;  %v292_v25 = vmax.f32 %v211_v22, 0.0 }
  0xea   :  { %v216_v26 = vpop.f32.mrf.mxu0 }
  0xeb   :  { %v293_v27 = vmax.f32 %v215_v24, 0.0  ;;  %629 = vst [vmem:[#allocation8 + $0x40] sm:$0xff] %v215_v24  ;;  %v217_v28 = vadd.f32 %v216_v26, %v1089_v63  ;;  %428 = vmatprep.mubr.f32.mxu1 %v292_v25  ;;  %596 = vst [vmem:[#allocation5 + $0x38] sm:$0xff] %v292_v25 }
  0xec   :  { %v220_v29 = vpop.f32.mrf.mxu0  ;;  %429 = vmatmul.mubr.f32.vlgmr.msra.gmra.mxu1 %v291_v21 }
  0xed   :  { %597 = vst [vmem:[#allocation5 + $0x40] sm:$0xff] %v293_v27  ;;  %v294_v30 = vmax.f32 %v217_v28, 0.0  ;;  %630 = vst [vmem:[#allocation8 + $0x48] sm:$0xff] %v217_v28  ;;  %v221_v31 = vadd.f32 %v220_v29, %v1087_v62 }
  0xee   :  { %v222_v32 = vpop.f32.mrf.mxu0 }
  0xef   :  { %598 = vst [vmem:[#allocation5 + $0x48] sm:$0xff] %v294_v30  ;;  %v295_v33 = vmax.f32 %v221_v31, 0.0  ;;  %631 = vst [vmem:[#allocation8 + $0x50] sm:$0xff] %v221_v31  ;;  %v223_v34 = vadd.f32 %v222_v32, %v1089_v63  ;;  %433 = vmatprep.mubr.f32.mxu1 %v294_v30 }
  0xf0   :  { %v226_v35 = vpop.f32.mrf.mxu0  ;;  %434 = vmatmul.mubr.f32.gmra.mxu1 %v293_v27 }
  0xf1   :  { %599 = vst [vmem:[#allocation5 + $0x50] sm:$0xff] %v295_v33  ;;  %v296_v36 = vmax.f32 %v223_v34, 0.0  ;;  %632 = vst [vmem:[#allocation8 + $0x58] sm:$0xff] %v223_v34  ;;  %v227_v37 = vadd.f32 %v226_v35, %v1087_v62 }
  0xf2   :  { %v228_v38 = vpop.f32.mrf.mxu0 }
  0xf3   :  { %600 = vst [vmem:[#allocation5 + $0x58] sm:$0xff] %v296_v36  ;;  %v297_v39 = vmax.f32 %v227_v37, 0.0  ;;  %633 = vst [vmem:[#allocation8 + $0x60] sm:$0xff] %v227_v37  ;;  %v229_v40 = vadd.f32 %v228_v38, %v1089_v63  ;;  %438 = vmatprep.mubr.f32.mxu1 %v296_v36 }
  0xf4   :  { %v232_v41 = vpop.f32.mrf.mxu0  ;;  %439 = vmatmul.mubr.f32.gmra.mxu1 %v295_v33 }
  0xf5   :  { %601 = vst [vmem:[#allocation5 + $0x60] sm:$0xff] %v297_v39  ;;  %v298_v42 = vmax.f32 %v229_v40, 0.0  ;;  %634 = vst [vmem:[#allocation8 + $0x68] sm:$0xff] %v229_v40  ;;  %v233_v43 = vadd.f32 %v232_v41, %v1087_v62 }
  0xf6   :  { %v234_v44 = vpop.f32.mrf.mxu0 }
  0xf7   :  { %602 = vst [vmem:[#allocation5 + $0x68] sm:$0xff] %v298_v42  ;;  %v299_v45 = vmax.f32 %v233_v43, 0.0  ;;  %635 = vst [vmem:[#allocation8 + $0x70] sm:$0xff] %v233_v43  ;;  %v235_v46 = vadd.f32 %v234_v44, %v1089_v63  ;;  %443 = vmatprep.mubr.f32.mxu1 %v298_v42 }
  0xf8   :  { %v238_v47 = vpop.f32.mrf.mxu0  ;;  %444 = vmatmul.mubr.f32.gmra.mxu1 %v297_v39 }
  0xf9   :  { %603 = vst [vmem:[#allocation5 + $0x70] sm:$0xff] %v299_v45  ;;  %v300_v48 = vmax.f32 %v235_v46, 0.0  ;;  %636 = vst [vmem:[#allocation8 + $0x78] sm:$0xff] %v235_v46  ;;  %v239_v49 = vadd.f32 %v238_v47, %v1087_v62 }
  0xfa   :  { %v240_v50 = vpop.f32.mrf.mxu0 }
  0xfb   :  { %604 = vst [vmem:[#allocation5 + $0x78] sm:$0xff] %v300_v48  ;;  %v301_v51 = vmax.f32 %v239_v49, 0.0  ;;  %637 = vst [vmem:[#allocation8 + $0x80] sm:$0xff] %v239_v49  ;;  %v241_v52 = vadd.f32 %v240_v50, %v1089_v63  ;;  %448 = vmatprep.mubr.f32.mxu1 %v300_v48 }
  0xfc   :  { %v244_v53 = vpop.f32.mrf.mxu0  ;;  %449 = vmatmul.mubr.f32.gmra.mxu1 %v299_v45 }
  0xfd   :  { %605 = vst [vmem:[#allocation5 + $0x80] sm:$0xff] %v301_v51  ;;  %v302_v54 = vmax.f32 %v241_v52, 0.0  ;;  %638 = vst [vmem:[#allocation8 + $0x88] sm:$0xff] %v241_v52  ;;  %v245_v55 = vadd.f32 %v244_v53, %v1087_v62 }
  0xfe   :  { %v246_v56 = vpop.f32.mrf.mxu0 }
  0xff   :  { %606 = vst [vmem:[#allocation5 + $0x88] sm:$0xff] %v302_v54  ;;  %v303_v57 = vmax.f32 %v245_v55, 0.0  ;;  %639 = vst [vmem:[#allocation8 + $0x90] sm:$0xff] %v245_v55  ;;  %v247_v58 = vadd.f32 %v246_v56, %v1089_v63  ;;  %453 = vmatprep.mubr.f32.mxu1 %v302_v54 }
 0x100   :  { %v250_v59 = vpop.f32.mrf.mxu0  ;;  %454 = vmatmul.mubr.f32.gmra.mxu1 %v301_v51 }
 0x101   :  { %607 = vst [vmem:[#allocation5 + $0x90] sm:$0xff] %v303_v57  ;;  %v304_v60 = vmax.f32 %v247_v58, 0.0  ;;  %640 = vst [vmem:[#allocation8 + $0x98] sm:$0xff] %v247_v58  ;;  %v251_v61 = vadd.f32 %v250_v59, %v1087_v62 }
 0x102   :  { %v252_v0 = vpop.f32.mrf.mxu0 }
 0x103   :  { %608 = vst [vmem:[#allocation5 + $0x98] sm:$0xff] %v304_v60  ;;  %v305_v1 = vmax.f32 %v251_v61, 0.0  ;;  %641 = vst [vmem:[#allocation8 + $0xa0] sm:$0xff] %v251_v61  ;;  %v253_v2 = vadd.f32 %v252_v0, %v1089_v63  ;;  %458 = vmatprep.mubr.f32.mxu1 %v304_v60 }
 0x104   :  { %v256_v3 = vpop.f32.mrf.mxu0  ;;  %459 = vmatmul.mubr.f32.gmra.mxu1 %v303_v57 }
 0x105   :  { %609 = vst [vmem:[#allocation5 + $0xa0] sm:$0xff] %v305_v1  ;;  %v306_v4 = vmax.f32 %v253_v2, 0.0  ;;  %642 = vst [vmem:[#allocation8 + $0xa8] sm:$0xff] %v253_v2  ;;  %v257_v5 = vadd.f32 %v256_v3, %v1087_v62 }
 0x106   :  { %v258_v6 = vpop.f32.mrf.mxu0 }
 0x107   :  { %610 = vst [vmem:[#allocation5 + $0xa8] sm:$0xff] %v306_v4  ;;  %v307_v7 = vmax.f32 %v257_v5, 0.0  ;;  %643 = vst [vmem:[#allocation8 + $0xb0] sm:$0xff] %v257_v5  ;;  %v259_v8 = vadd.f32 %v258_v6, %v1089_v63  ;;  %463 = vmatprep.mubr.f32.mxu1 %v306_v4 }
 0x108   :  { %v262_v9 = vpop.f32.mrf.mxu0  ;;  %464 = vmatmul.mubr.f32.gmra.mxu1 %v305_v1 }
 0x109   :  { %611 = vst [vmem:[#allocation5 + $0xb0] sm:$0xff] %v307_v7  ;;  %v308_v10 = vmax.f32 %v259_v8, 0.0  ;;  %644 = vst [vmem:[#allocation8 + $0xb8] sm:$0xff] %v259_v8  ;;  %v263_v11 = vadd.f32 %v262_v9, %v1087_v62 }
 0x10a   :  { %v264_v12 = vpop.f32.mrf.mxu0 }
 0x10b   :  { %612 = vst [vmem:[#allocation5 + $0xb8] sm:$0xff] %v308_v10  ;;  %v309_v13 = vmax.f32 %v263_v11, 0.0  ;;  %645 = vst [vmem:[#allocation8 + $0xc0] sm:$0xff] %v263_v11  ;;  %v265_v14 = vadd.f32 %v264_v12, %v1089_v63  ;;  %468 = vmatprep.mubr.f32.mxu1 %v308_v10 }
 0x10c   :  { %v268_v15 = vpop.f32.mrf.mxu0  ;;  %469 = vmatmul.mubr.f32.gmra.mxu1 %v307_v7 }
 0x10d   :  { %613 = vst [vmem:[#allocation5 + $0xc0] sm:$0xff] %v309_v13  ;;  %v310_v16 = vmax.f32 %v265_v14, 0.0  ;;  %646 = vst [vmem:[#allocation8 + $0xc8] sm:$0xff] %v265_v14  ;;  %v269_v17 = vadd.f32 %v268_v15, %v1087_v62 }
 0x10e   :  { %v270_v18 = vpop.f32.mrf.mxu0 }
 0x10f   :  { %614 = vst [vmem:[#allocation5 + $0xc8] sm:$0xff] %v310_v16  ;;  %v311_v19 = vmax.f32 %v269_v17, 0.0  ;;  %647 = vst [vmem:[#allocation8 + $0xd0] sm:$0xff] %v269_v17  ;;  %v271_v20 = vadd.f32 %v270_v18, %v1089_v63  ;;  %473 = vmatprep.mubr.f32.mxu1 %v310_v16 }
 0x110   :  { %v274_v21 = vpop.f32.mrf.mxu0  ;;  %474 = vmatmul.mubr.f32.gmra.mxu1 %v309_v13 }
 0x111   :  { %615 = vst [vmem:[#allocation5 + $0xd0] sm:$0xff] %v311_v19  ;;  %v312_v22 = vmax.f32 %v271_v20, 0.0  ;;  %648 = vst [vmem:[#allocation8 + $0xd8] sm:$0xff] %v271_v20  ;;  %v275_v23 = vadd.f32 %v274_v21, %v1087_v62 }
 0x112   :  { %v276_v24 = vpop.f32.mrf.mxu0 }
 0x113   :  { %616 = vst [vmem:[#allocation5 + $0xd8] sm:$0xff] %v312_v22  ;;  %v313_v25 = vmax.f32 %v275_v23, 0.0  ;;  %649 = vst [vmem:[#allocation8 + $0xe0] sm:$0xff] %v275_v23  ;;  %v277_v26 = vadd.f32 %v276_v24, %v1089_v63  ;;  %478 = vmatprep.mubr.f32.mxu1 %v312_v22 }
 0x114   :  { %v280_v27 = vpop.f32.mrf.mxu0  ;;  %479 = vmatmul.mubr.f32.gmra.mxu1 %v311_v19 }
 0x115   :  { %617 = vst [vmem:[#allocation5 + $0xe0] sm:$0xff] %v313_v25  ;;  %v314_v28 = vmax.f32 %v277_v26, 0.0  ;;  %650 = vst [vmem:[#allocation8 + $0xe8] sm:$0xff] %v277_v26  ;;  %v281_v29 = vadd.f32 %v280_v27, %v1087_v62 }
 0x116   :  { %v282_v30 = vpop.f32.mrf.mxu0 }
 0x117   :  { %618 = vst [vmem:[#allocation5 + $0xe8] sm:$0xff] %v314_v28  ;;  %v315_v31 = vmax.f32 %v281_v29, 0.0  ;;  %651 = vst [vmem:[#allocation8 + $0xf0] sm:$0xff] %v281_v29  ;;  %v283_v32 = vadd.f32 %v282_v30, %v1089_v63  ;;  %483 = vmatprep.mubr.f32.mxu1 %v314_v28 }
 0x118   :  { %484 = vmatmul.mubr.f32.gmra.mxu1 %v313_v25 }
 0x119   :  { %619 = vst [vmem:[#allocation5 + $0xf0] sm:$0xff] %v315_v31  ;;  %v316_v33 = vmax.f32 %v283_v32, 0.0  ;;  %652 = vst [vmem:[#allocation8 + $0xf8] sm:$0xff] %v283_v32 }
 0x11b   :  { %620 = vst [vmem:[#allocation5 + $0xf8] sm:$0xff] %v316_v33  ;;  %488 = vmatprep.mubr.f32.mxu1 %v316_v33 }
 0x11c   :  { %489 = vmatmul.mubr.f32.gmra.mxu1 %v315_v31 }
 0x11d   :  { %870 = shalt.err (!%p867_p9)
}
 0x11e   :  { %s930_s13 = smov 256   ;;  %s931_s14 = smov 16   ;;  %v1132_v34 = vld [vmem:[%s1166_s4] ss:$0 sm:$0xff] }
 0x11f   :  { %664 = dma.vmem_to_hbm [thread:$0]  %s659_s11, 4096, %s1167_s5, [#allocation4], %s930_s13, %s930_s13, %s931_s14  }
 0x120   :  { %s932_s4 = smov [#allocation6]   ;;  %s933_s18 = smov [#allocation8]  }
 0x121   :  { %s670_s5 = sshll.u32 %s932_s4, 4  ;;  %s682_s19 = sshll.u32 %s933_s18, 4  ;;  %s671_s5 = int_to_ptr.vmem [resolvable:$true] %s670_s5  ;;  %s683_s19 = int_to_ptr.vmem [resolvable:$true] %s682_s19 }
 0x122   :  { %s879_s20 = scalar_lea.vmem %s671_s5, 2048  ;;  %p884_p11 = scmp.lt.s32.totalorder %s671_s5, %s671_s5 }
 0x123   :  { %p880_p10 = scmp.ne.s32.totalorder %s671_s5, %s879_s20  ;;  %p885_p12 = scmp.lt.s32.totalorder %s879_s20, %s879_s20 }
 0x125   :  { %p886_p13 = por %p885_p12, %p884_p11 }
 0x127   :  { %p887_p0 = pnand %p886_p13, %p880_p10 }
 0x1a0   :  { %v750_v62 = vpop.f32.mrf.mxu0 }
 0x1a2   :  { %v751_v63 = vpop.f32.mrf.mxu0 }
 0x1a3   :  { %v752_v35 = vadd.f32 %v751_v63, %v750_v62 }
 0x1a4   :  { %v753_v36 = vpop.f32.mrf.mxu0 }
 0x1a5   :  { %v505_v37 = vadd.f32 %v752_v35, %v1132_v34 }
 0x1a6   :  { %v754_v38 = vpop.f32.mrf.mxu0 }
 0x1a7   :  { %521 = vst [vmem:[#allocation6] sm:$0xff] %v505_v37  ;;  %v755_v39 = vadd.f32 %v754_v38, %v753_v36 }
 0x1a8   :  { %v756_v40 = vpop.f32.mrf.mxu0 }
 0x1a9   :  { %v506_v41 = vadd.f32 %v755_v39, %v1132_v34 }
 0x1aa   :  { %v757_v42 = vpop.f32.mrf.mxu0 }
 0x1ab   :  { %522 = vst [vmem:[#allocation6 + $0x8] sm:$0xff] %v506_v41  ;;  %v758_v43 = vadd.f32 %v757_v42, %v756_v40 }
 0x1ac   :  { %v759_v44 = vpop.f32.mrf.mxu1 }
 0x1ad   :  { %v507_v45 = vadd.f32 %v758_v43, %v1132_v34 }
 0x1ae   :  { %v760_v46 = vpop.f32.mrf.mxu1 }
 0x1af   :  { %523 = vst [vmem:[#allocation6 + $0x10] sm:$0xff] %v507_v45  ;;  %v761_v47 = vadd.f32 %v760_v46, %v759_v44 }
 0x1b0   :  { %v762_v48 = vpop.f32.mrf.mxu1 }
 0x1b1   :  { %v508_v49 = vadd.f32 %v761_v47, %v1132_v34 }
 0x1b2   :  { %v763_v50 = vpop.f32.mrf.mxu1 }
 0x1b3   :  { %524 = vst [vmem:[#allocation6 + $0x18] sm:$0xff] %v508_v49  ;;  %v764_v51 = vadd.f32 %v763_v50, %v762_v48 }
 0x1b4   :  { %v765_v52 = vpop.f32.mrf.mxu1 }
 0x1b5   :  { %v509_v53 = vadd.f32 %v764_v51, %v1132_v34 }
 0x1b6   :  { %v766_v54 = vpop.f32.mrf.mxu1 }
 0x1b7   :  { %525 = vst [vmem:[#allocation6 + $0x20] sm:$0xff] %v509_v53  ;;  %v767_v55 = vadd.f32 %v766_v54, %v765_v52 }
 0x1b8   :  { %v768_v56 = vpop.f32.mrf.mxu1 }
 0x1b9   :  { %v510_v57 = vadd.f32 %v767_v55, %v1132_v34 }
 0x1ba   :  { %v769_v58 = vpop.f32.mrf.mxu1 }
 0x1bb   :  { %526 = vst [vmem:[#allocation6 + $0x28] sm:$0xff] %v510_v57  ;;  %v770_v59 = vadd.f32 %v769_v58, %v768_v56 }
 0x1bc   :  { %v771_v60 = vpop.f32.mrf.mxu1 }
 0x1bd   :  { %v511_v61 = vadd.f32 %v770_v59, %v1132_v34 }
 0x1be   :  { %v772_v0 = vpop.f32.mrf.mxu1 }
 0x1bf   :  { %527 = vst [vmem:[#allocation6 + $0x30] sm:$0xff] %v511_v61  ;;  %v773_v1 = vadd.f32 %v772_v0, %v771_v60 }
 0x1c0   :  { %v774_v2 = vpop.f32.mrf.mxu1 }
 0x1c1   :  { %v512_v3 = vadd.f32 %v773_v1, %v1132_v34 }
 0x1c2   :  { %v775_v4 = vpop.f32.mrf.mxu1 }
 0x1c3   :  { %528 = vst [vmem:[#allocation6 + $0x38] sm:$0xff] %v512_v3  ;;  %v776_v5 = vadd.f32 %v775_v4, %v774_v2 }
 0x1c4   :  { %v777_v6 = vpop.f32.mrf.mxu1 }
 0x1c5   :  { %v513_v7 = vadd.f32 %v776_v5, %v1132_v34 }
 0x1c6   :  { %v778_v8 = vpop.f32.mrf.mxu1 }
 0x1c7   :  { %529 = vst [vmem:[#allocation6 + $0x40] sm:$0xff] %v513_v7  ;;  %v779_v9 = vadd.f32 %v778_v8, %v777_v6 }
 0x1c8   :  { %v780_v10 = vpop.f32.mrf.mxu1 }
 0x1c9   :  { %v514_v11 = vadd.f32 %v779_v9, %v1132_v34 }
 0x1ca   :  { %v781_v12 = vpop.f32.mrf.mxu1 }
 0x1cb   :  { %530 = vst [vmem:[#allocation6 + $0x48] sm:$0xff] %v514_v11  ;;  %v782_v13 = vadd.f32 %v781_v12, %v780_v10 }
 0x1cc   :  { %v783_v14 = vpop.f32.mrf.mxu1 }
 0x1cd   :  { %v515_v15 = vadd.f32 %v782_v13, %v1132_v34 }
 0x1ce   :  { %v784_v16 = vpop.f32.mrf.mxu1 }
 0x1cf   :  { %531 = vst [vmem:[#allocation6 + $0x50] sm:$0xff] %v515_v15  ;;  %v785_v17 = vadd.f32 %v784_v16, %v783_v14 }
 0x1d0   :  { %v786_v18 = vpop.f32.mrf.mxu1 }
 0x1d1   :  { %v516_v19 = vadd.f32 %v785_v17, %v1132_v34 }
 0x1d2   :  { %v787_v20 = vpop.f32.mrf.mxu1 }
 0x1d3   :  { %532 = vst [vmem:[#allocation6 + $0x58] sm:$0xff] %v516_v19  ;;  %v788_v21 = vadd.f32 %v787_v20, %v786_v18 }
 0x1d4   :  { %v789_v22 = vpop.f32.mrf.mxu1 }
 0x1d5   :  { %v517_v23 = vadd.f32 %v788_v21, %v1132_v34 }
 0x1d6   :  { %v790_v24 = vpop.f32.mrf.mxu1 }
 0x1d7   :  { %533 = vst [vmem:[#allocation6 + $0x60] sm:$0xff] %v517_v23  ;;  %v791_v25 = vadd.f32 %v790_v24, %v789_v22 }
 0x1d8   :  { %v792_v26 = vpop.f32.mrf.mxu1 }
 0x1d9   :  { %v518_v27 = vadd.f32 %v791_v25, %v1132_v34 }
 0x1da   :  { %v793_v28 = vpop.f32.mrf.mxu1 }
 0x1db   :  { %534 = vst [vmem:[#allocation6 + $0x68] sm:$0xff] %v518_v27  ;;  %v794_v29 = vadd.f32 %v793_v28, %v792_v26 }
 0x1dc   :  { %v795_v30 = vpop.f32.mrf.mxu1 }
 0x1dd   :  { %v519_v31 = vadd.f32 %v794_v29, %v1132_v34 }
 0x1de   :  { %v796_v32 = vpop.f32.mrf.mxu1 }
 0x1df   :  { %535 = vst [vmem:[#allocation6 + $0x70] sm:$0xff] %v519_v31  ;;  %v797_v33 = vadd.f32 %v796_v32, %v795_v30 }
 0x1e1   :  { %v520_v62 = vadd.f32 %v797_v33, %v1132_v34 }
 0x1e3   :  { %536 = vst [vmem:[#allocation6 + $0x78] sm:$0xff] %v520_v62 }
 0x1e4   :  { %890 = shalt.err (!%p887_p0)
}
 0x1e5   :  { %676 = dma.vmem_to_hbm [thread:$0]  %s671_s5, 2048, %s1168_s6, [#allocation7], %s926_s27, %s926_s27, %s927_s28  }
 0x1e6   :  { %s899_s23 = scalar_lea.vmem %s683_s19, 4096  ;;  %p904_p2 = scmp.lt.s32.totalorder %s683_s19, %s683_s19 }
 0x1e7   :  { %p900_p1 = scmp.ne.s32.totalorder %s683_s19, %s899_s23  ;;  %p905_p3 = scmp.lt.s32.totalorder %s899_s23, %s899_s23 }
 0x1e9   :  { %p906_p4 = por %p905_p3, %p904_p2 }
 0x1eb   :  { %p907_p5 = pnand %p906_p4, %p900_p1 }
 0x1ed   :  { %910 = shalt.err (!%p907_p5)
}
 0x1ee   :  { %688 = dma.vmem_to_hbm [thread:$0]  %s683_s19, 4096, %s1169_s7, [#allocation7], %s930_s13, %s930_s13, %s931_s14  }
 0x1ef   :  { %921 = dma.done.wait [#allocation4], 4096  }
 0x1f0   :  { %922 = vsyncadd [#allocation4], 4294963200 }
 0x1f1   :  { %923 = dma.done.wait [#allocation7], 6144  }
 0x1f2   :  { %924 = vsyncadd [#allocation7], 4294961152 }
 0x1f3   :  { %698 = vsyncpa [#allocation3], 1 }
 0x1f4   :  { %699 = vsyncpa [#allocation4], 1 }
 0x1f5   :  { %700 = vsyncpa [#allocation7], 1 }

</bundles_post_ra>
